<compile_context>
chip_gen: v6e
topology: v6e:2x2x1
jax: 0.10.0
libtpu: 0.0.40
codegen_flags: <defaults>
</compile_context>

<pallas_src>
import jax
import jax.numpy as jnp
from jax.experimental import pallas as pl
from jax.experimental.pallas import tpu as pltpu


def _mlp_kernel(x_ref, w1_ref, b1_ref, w2_ref, b2_ref, o_ref):
    # x_ref:  (TB, D)   flattened input tile (f32 or bf16)
    # w1_ref: (D, H)    fc_layer weight, in-major
    # b1_ref: (1, H)    fc_layer bias (f32)
    # w2_ref: (H, C)    output_layer weight, in-major
    # b2_ref: (1, C)    output_layer bias (f32)
    # o_ref:  (TB, C)   logits (f32)
    x = x_ref[...]
    h = jnp.dot(x, w1_ref[...], preferred_element_type=jnp.float32) + b1_ref[...]
    h = jnp.maximum(h, 0.0)                                   # ReLU in f32
    h = h.astype(w2_ref.dtype)
    y = jnp.dot(h, w2_ref[...], preferred_element_type=jnp.float32) + b2_ref[...]
    o_ref[...] = y.astype(o_ref.dtype)


def _round_up(v, m):
    return (v + m - 1) // m * m


def rl_forward(x, w1, b1, w2, b2, *, block_b=None):
    """Forward pass of `RL`.

    x:  (B, ...)  any trailing shape; flattened like x.view(B, -1)
    w1: (H, D)    PyTorch nn.Linear weight layout (out, in)
    b1: (H,)
    w2: (C, H)
    b2: (C,)
    returns (B, C) float32 logits
    """
    B = x.shape[0]
    # Accept bf16 or f32 directly (no extra HBM pass over the x stream); anything
    # else promotes to f32.
    in_dtype = x.dtype if x.dtype in (jnp.bfloat16, jnp.float32) else jnp.float32
    x2 = x.reshape(B, -1)                          # free row-major flatten
    if x2.dtype != in_dtype:
        x2 = x2.astype(in_dtype)
    D = x2.shape[1]
    H = w1.shape[0]
    C = w2.shape[0]
    bytes_x = jnp.dtype(in_dtype).itemsize

    # One-time weight prep (tiny): transpose to (in, out) so the kernel contracts
    # the last axis of the activation directly on the MXU. Weights follow the input
    # dtype; biases stay f32 for the f32 epilogue (accumulator dtype).
    w1_k = jnp.transpose(w1).astype(in_dtype)      # (D, H)
    w2_k = jnp.transpose(w2).astype(in_dtype)      # (H, C)
    b1_k = b1.reshape(1, H).astype(jnp.float32)
    b2_k = b2.reshape(1, C).astype(jnp.float32)

    # Batch tiling:
    #  * tiny B: one full block (block == full array dims satisfies the (8,128) rule)
    #  * moderate/large B: >= 2 blocks (so v7x's two TCs both get work via the
    #    "parallel" grid axis), tiles up to 4096 rows (near HBM roofline), rows a
    #    multiple of 8.
    #  * the final block may be partial: Pallas masks the writeback, so no host-side
    #    pad of x or slice of the output is needed.
    if block_b is None:
        if B <= 256:
            block_b = B
        else:
            block_b = min(4096, _round_up(pl.cdiv(B, 2), 8))
    nb = pl.cdiv(B, block_b)

    # Scoped-VMEM estimate including lane padding (D=32, C=10 both pad to 128 lanes).
    bb_pad = _round_up(block_b, 8)
    vmem_est = (
        2 * bb_pad * _round_up(D, 128) * bytes_x                  # x tile, double-buf
        + 2 * bb_pad * _round_up(C, 128) * 4                      # out tile, double-buf
        + 2 * (_round_up(D, 8) * _round_up(H, 128)
               + _round_up(H, 8) * _round_up(C, 128)) * bytes_x   # weights
        + 2 * 8 * (_round_up(H, 128) + _round_up(C, 128)) * 4     # biases
    )
    vmem_limit = None
    if vmem_est > 12 * 1024 * 1024:   # only needed if caller pushes block_b past ~4K
        vmem_limit = min(vmem_est + (4 << 20), 56 << 20)

    cost = pl.CostEstimate(
        flops=2 * B * (D * H + H * C),
        transcendentals=0,
        bytes_accessed=(B * D * bytes_x + (D * H + H * C) * bytes_x
                        + (H + C) * 4 + B * C * 4),
    )

    out = pl.pallas_call(
        _mlp_kernel,
        out_shape=jax.ShapeDtypeStruct((B, C), jnp.float32),
        grid_spec=pltpu.PrefetchScalarGridSpec(
            num_scalar_prefetch=0,
            grid=(nb,),
            in_specs=[
                pl.BlockSpec((block_b, D), lambda i: (i, 0)),
                pl.BlockSpec((D, H), lambda i: (0, 0)),
                pl.BlockSpec((1, H), lambda i: (0, 0)),
                pl.BlockSpec((H, C), lambda i: (0, 0)),
                pl.BlockSpec((1, C), lambda i: (0, 0)),
            ],
            out_specs=pl.BlockSpec((block_b, C), lambda i: (i, 0)),
        ),
        compiler_params=pltpu.CompilerParams(
            dimension_semantics=("parallel",),
            vmem_limit_bytes=vmem_limit,
        ),
        cost_estimate=cost,
    )(x2, w1_k, b1_k, w2_k, b2_k)
    return out


def _reference(x, w1, b1, w2, b2):
    """Pure-JAX reference mirroring the PyTorch forward."""
    B = x.shape[0]
    x2 = x.reshape(B, -1).astype(jnp.float32)
    h = jnp.maximum(x2 @ w1.astype(jnp.float32).T + b1.astype(jnp.float32), 0.0)
    return h @ w2.astype(jnp.float32).T + b2.astype(jnp.float32)


if __name__ == "__main__":
    key = jax.random.PRNGKey(0)

    # Module params: input_size=4, port_num=2 -> flattened D = 4*4*2 = 32,
    # hidden_dim=64, num_classes=10, batch=2.
    input_size, port_num, num_classes = 4, 2, 10
    D = input_size * input_size * port_num          # 32
    H = 64
    C = num_classes
    B = 2

    k = jax.random.split(key, 6)
    x = jax.random.normal(k[0], (B, port_num, input_size, input_size), dtype=jnp.float32)
    # nn.Linear-style init (uniform in +/- 1/sqrt(fan_in)).
    w1 = jax.random.uniform(k[1], (H, D), jnp.float32, -1.0, 1.0) / jnp.sqrt(D)
    b1 = jax.random.uniform(k[2], (H,), jnp.float32, -1.0, 1.0) / jnp.sqrt(D)
    w2 = jax.random.uniform(k[3], (C, H), jnp.float32, -1.0, 1.0) / jnp.sqrt(H)
    b2 = jax.random.uniform(k[4], (C,), jnp.float32, -1.0, 1.0) / jnp.sqrt(H)

    # Main check: the module's test-sized forward (single full-batch block).
    out = rl_forward(x, w1, b1, w2, b2)
    out = jax.block_until_ready(out)
    ref = _reference(x, w1, b1, w2, b2)
    assert out.shape == (B, C)
    assert jnp.allclose(out, ref, atol=1e-4, rtol=1e-4), "mismatch vs reference (B=2)"

    # Secondary check: multi-block grid with a partial final batch block
    # (exercises the no-pad / masked-writeback path).
    B2 = 300
    x_big = jax.random.normal(k[5], (B2, port_num, input_size, input_size),
                              dtype=jnp.float32)
    out_big = jax.block_until_ready(rl_forward(x_big, w1, b1, w2, b2))
    ref_big = _reference(x_big, w1, b1, w2, b2)
    assert out_big.shape == (B2, C)
    assert jnp.allclose(out_big, ref_big, atol=1e-4, rtol=1e-4), \
        "mismatch vs reference (B=300, partial final block)"

    print("KERNEL_OK")
</pallas_src>

<mosaic_0001>
module attributes {stable_mosaic.version = 11 : i64} {
  func.func @_mlp_kernel(%arg0: i32, %arg1: memref<2x32xf32, #tpu.memory_space<vmem>>, %arg2: memref<32x64xf32, #tpu.memory_space<vmem>>, %arg3: memref<1x64xf32, #tpu.memory_space<vmem>>, %arg4: memref<64x10xf32, #tpu.memory_space<vmem>>, %arg5: memref<1x10xf32, #tpu.memory_space<vmem>>, %arg6: memref<2x10xf32, #tpu.memory_space<vmem>>) attributes {dimension_semantics = [#tpu.dimension_semantics<parallel>], iteration_bounds = array<i64: 1>, scalar_prefetch = 0 : i64, scratch_operands = 0 : i64, tpu.core_type = #tpu.core_type<tc>, window_params = [{transform_indices = @transform_0, window_bounds = array<i64: 2, 32>}, {pipeline_mode = #tpu.pipeline_mode<synchronous>, transform_indices = @transform_1, window_bounds = array<i64: 32, 64>}, {pipeline_mode = #tpu.pipeline_mode<synchronous>, transform_indices = @transform_2, window_bounds = array<i64: 1, 64>}, {pipeline_mode = #tpu.pipeline_mode<synchronous>, transform_indices = @transform_3, window_bounds = array<i64: 64, 10>}, {pipeline_mode = #tpu.pipeline_mode<synchronous>, transform_indices = @transform_4, window_bounds = array<i64: 1, 10>}, {transform_indices = @transform_5, window_bounds = array<i64: 2, 10>}]} {
    %c0 = arith.constant 0 : index
    %c0_0 = arith.constant 0 : index
    %0 = vector.load %arg1[%c0, %c0_0] : memref<2x32xf32, #tpu.memory_space<vmem>>, vector<2x32xf32>
    %c0_1 = arith.constant 0 : index
    %c0_2 = arith.constant 0 : index
    %1 = vector.load %arg2[%c0_1, %c0_2] : memref<32x64xf32, #tpu.memory_space<vmem>>, vector<32x64xf32>
    %cst = arith.constant dense<0.000000e+00> : vector<2x64xf32>
    %2 = tpu.matmul %0, %1, %cst {dimension_numbers = #tpu.dot_dimension_numbers<[1], [0], [0], [1], [0, 0, 1, 1], [], []>} : vector<2x32xf32>, vector<32x64xf32>, vector<2x64xf32> -> vector<2x64xf32>
    %c0_3 = arith.constant 0 : index
    %c0_4 = arith.constant 0 : index
    %3 = vector.load %arg3[%c0_3, %c0_4] : memref<1x64xf32, #tpu.memory_space<vmem>>, vector<1x64xf32>
    %4 = vector.broadcast %3 : vector<1x64xf32> to vector<2x64xf32>
    %5 = arith.addf %2, %4 : vector<2x64xf32>
    %cst_5 = arith.constant 0.000000e+00 : f32
    %6 = vector.broadcast %cst_5 : f32 to vector<2x64xf32>
    %7 = arith.maximumf %5, %6 : vector<2x64xf32>
    %c0_6 = arith.constant 0 : index
    %c0_7 = arith.constant 0 : index
    %8 = vector.load %arg4[%c0_6, %c0_7] : memref<64x10xf32, #tpu.memory_space<vmem>>, vector<64x10xf32>
    %cst_8 = arith.constant dense<0.000000e+00> : vector<2x10xf32>
    %9 = tpu.matmul %7, %8, %cst_8 {dimension_numbers = #tpu.dot_dimension_numbers<[1], [0], [0], [1], [0, 0, 1, 1], [], []>} : vector<2x64xf32>, vector<64x10xf32>, vector<2x10xf32> -> vector<2x10xf32>
    %c0_9 = arith.constant 0 : index
    %c0_10 = arith.constant 0 : index
    %10 = vector.load %arg5[%c0_9, %c0_10] : memref<1x10xf32, #tpu.memory_space<vmem>>, vector<1x10xf32>
    %11 = vector.broadcast %10 : vector<1x10xf32> to vector<2x10xf32>
    %12 = arith.addf %9, %11 : vector<2x10xf32>
    %c0_11 = arith.constant 0 : index
    %c0_12 = arith.constant 0 : index
    %13 = vector.load %arg6[%c0_11, %c0_12] : memref<2x10xf32, #tpu.memory_space<vmem>>, vector<2x10xf32>
    tpu.vector_store %arg6[%c0_11, %c0_12], %12 {strides = array<i32>} : memref<2x10xf32, #tpu.memory_space<vmem>>, vector<2x10xf32>,
    return
  }
  func.func @transform_0(%arg0: i32) -> (i32, i32) {
    %c0_i32 = arith.constant 0 : i32
    %c0_i32_0 = arith.constant 0 : i32
    return %arg0, %c0_i32 : i32, i32
  }
  func.func @transform_1(%arg0: i32) -> (i32, i32) {
    %c0_i32 = arith.constant 0 : i32
    %c0_i32_0 = arith.constant 0 : i32
    %c0_i32_1 = arith.constant 0 : i32
    return %c0_i32, %c0_i32_0 : i32, i32
  }
  func.func @transform_2(%arg0: i32) -> (i32, i32) {
    %c0_i32 = arith.constant 0 : i32
    %c0_i32_0 = arith.constant 0 : i32
    %c0_i32_1 = arith.constant 0 : i32
    return %c0_i32, %c0_i32_0 : i32, i32
  }
  func.func @transform_3(%arg0: i32) -> (i32, i32) {
    %c0_i32 = arith.constant 0 : i32
    %c0_i32_0 = arith.constant 0 : i32
    %c0_i32_1 = arith.constant 0 : i32
    return %c0_i32, %c0_i32_0 : i32, i32
  }
  func.func @transform_4(%arg0: i32) -> (i32, i32) {
    %c0_i32 = arith.constant 0 : i32
    %c0_i32_0 = arith.constant 0 : i32
    %c0_i32_1 = arith.constant 0 : i32
    return %c0_i32, %c0_i32_0 : i32, i32
  }
  func.func @transform_5(%arg0: i32) -> (i32, i32) {
    %c0_i32 = arith.constant 0 : i32
    %c0_i32_0 = arith.constant 0 : i32
    return %arg0, %c0_i32 : i32, i32
  }
}

</mosaic_0001>

<bundles_post_ra>
// kernel: tpu_custom_call.1
= control target key start
LH: loop header
LB: loop body
LE: loop exit
PB: predicated region body
PF: predicated region fallthrough
CT: control target
= control target key end

     0   :  { %v286_v1 = vmov 0.0   ;;  %vm287_vm0 = vmmov 0   ;;  %s369_s0 = inlined_call_operand.vmem [shape: f32[2,32], index: 0, kind: input, shape index: {}]   ;;  %s370_s1 = inlined_call_operand.vmem [shape: f32[32,64], index: 1, kind: input, shape index: {}]   ;;  %s371_s2 = inlined_call_operand.vmem [shape: f32[1,64], index: 2, kind: input, shape index: {}]   ;;  %s372_s3 = inlined_call_operand.vmem [shape: f32[64,10], index: 3, kind: input, shape index: {}]   ;;  %s373_s4 = inlined_call_operand.vmem [shape: f32[1,10], index: 4, kind: input, shape index: {}]   ;;  %s374_s5 = inlined_call_operand.hbm [shape: f32[2,10], index: 5, kind: output, shape index: {}]  }
   0x1   :  { %v25_v0 = vld [vmem:[%s370_s1 + $0x18] sm:$0xff]  ;;  %231 = vmatprep.subr.mxu0 %v286_v1  ;;  %v24_v2 = vld [vmem:[%s370_s1 + $0x10] sm:$0xff]  ;;  %239 = vmatprep.mubr.msk.f32.mxu0 %vm287_vm0, %v286_v1  ;;  %v23_v5 = vld [vmem:[%s370_s1 + $0x8] sm:$0xff] }
   0x2   :  { %v115_v3 = vld [vmem:[%s372_s3 + $0x38] sm:$0xff]  ;;  %232 = vmatpush3.msra.mxu0 %v25_v0  ;;  %242 = vmatprep.subr.mxu1 %v286_v1  ;;  %v114_v4 = vld [vmem:[%s372_s3 + $0x30] sm:$0xff] }
   0x3   :  { %233 = vmatprep.subr.mxu0 %v286_v1  ;;  %243 = vmatpush3.msra.mxu1 %v115_v3 }
   0x4   :  { %10 = vsyncpa [#allocation3], 0  ;;  %234 = vmatpush3.msra.mxu0 %v24_v2  ;;  %244 = vmatprep.subr.mxu1 %v286_v1  ;;  %v113_v6 = vld [vmem:[%s372_s3 + $0x28] sm:$0xff]  ;;  %v22_v7 = vld [vmem:[%s370_s1] sm:$0xff]  ;;  %vm33_vm1 = vcmask 261120   ;;  %vm123_vm2 = vcmask 523264  }
   0x5   :  { %235 = vmatprep.subr.mxu0 %v286_v1  ;;  %245 = vmatpush3.msra.mxu1 %v114_v4  ;;  %v21_v8 = vld [vmem:[%s369_s0] sm:$0x3]  ;;  %v111_v10 = vld [vmem:[%s372_s3 + $0x18] sm:$0xff]  ;;  %v110_v11 = vld [vmem:[%s372_s3 + $0x10] sm:$0xff]  ;;  %s288_s21 = smov [#allocation2]   ;;  %vm197_vm3 = vcmask 74752  }
   0x6   :  { %236 = vmatpush3.msra.mxu0 %v23_v5  ;;  %246 = vmatprep.subr.mxu1 %v286_v1  ;;  %v112_v9 = vld [vmem:[%s372_s3 + $0x20] sm:$0xff]  ;;  %v109_v12 = vld [vmem:[%s372_s3 + $0x8] sm:$0xff]  ;;  %s205_s22 = sshll.u32 %s288_s21, 4  ;;  %s206_s22 = int_to_ptr.vmem [resolvable:$true] %s205_s22 }
   0x7   :  { %237 = vmatprep.subr.mxu0 %v286_v1  ;;  %247 = vmatpush3.msra.mxu1 %v113_v6  ;;  %v108_v13 = vld [vmem:[%s372_s3] sm:$0xff]  ;;  %s264_s3 = scalar_lea.vmem %s206_s22, 32  ;;  %p269_p1 = scmp.lt.s32.totalorder %s206_s22, %s206_s22 }
   0x8   :  { %238 = vmatpush3.msra.mxu0 %v22_v7  ;;  %248 = vmatprep.subr.mxu1 %v286_v1  ;;  %v213_v14 = vld [vmem:[%s371_s2] ss:$0 sm:$0xff]  ;;  %p265_p0 = scmp.ne.s32.totalorder %s206_s22, %s264_s3  ;;  %p270_p2 = scmp.lt.s32.totalorder %s264_s3, %s264_s3 }
   0x9   :  { %240 = vmatmul.mubr.msk.f32.vlgmr.msra.gmra.mxu0 %vm33_vm1, %v21_v8  ;;  %249 = vmatpush3.msra.mxu1 %v112_v9  ;;  %v215_v19 = vld [vmem:[%s373_s4] ss:$0 sm:$0xff] }
   0xa   :  { %250 = vmatprep.subr.mxu1 %v286_v1  ;;  %258 = vmatprep.mubr.msk.f32.mxu1 %vm287_vm0, %v286_v1  ;;  %p271_p3 = por %p270_p2, %p269_p1 }
   0xb   :  { %251 = vmatpush3.msra.mxu1 %v111_v10 }
   0xc   :  { %252 = vmatprep.subr.mxu1 %v286_v1  ;;  %p272_p4 = pnand %p271_p3, %p265_p0 }
   0xd   :  { %253 = vmatpush3.msra.mxu1 %v110_v11 }
   0xe   :  { %254 = vmatprep.subr.mxu1 %v286_v1 }
   0xf   :  { %255 = vmatpush3.msra.mxu1 %v109_v12 }
  0x10   :  { %256 = vmatprep.subr.mxu1 %v286_v1 }
  0x11   :  { %257 = vmatpush3.msra.mxu1 %v108_v13 }
  0xc9   :  { %v103_v15 = vpop.f32.mrf.mxu0 }
  0xca   :  { %v104_v16 = vadd.f32 %v213_v14, %v103_v15 }
  0xcb   :  { %v241_v17 = vpop.f32.mrf.mxu0 }
  0xcc   :  { %v107_v18 = vmax.f32 %v104_v16, 0.0 }
  0xce   :  { %259 = vmatmul.mubr.msk.f32.vlgmr.msra.gmra.mxu1 %vm123_vm2, %v107_v18 }
 0x18e   :  { %v193_v20 = vpop.f32.mrf.mxu1 }
 0x18f   :  { %v194_v21 = vadd.f32 %v215_v19, %v193_v20 }
 0x190   :  { %v260_v22 = vpop.f32.mrf.mxu1 }
 0x191   :  { %198 = vst.msk [vmem:[#allocation2] sm:$0x3] %vm197_vm3, %v194_v21 }
 0x192   :  { %275 = shalt.err (!%p272_p4)
}
 0x193   :  { %208 = dma.vmem_to_hbm [thread:$0]  %s206_s22, 32, %s374_s5, [#allocation3]  }
 0x194   :  { %284 = dma.done.wait [#allocation3], 32  }
 0x195   :  { %285 = vsyncadd [#allocation3], 4294967264 }
 0x196   :  { %212 = vsyncpa [#allocation3], 1 }

</bundles_post_ra>
